<compile_context>
chip_gen: v5e
topology: v5e:2x2
jax: 0.10.0
libtpu: 0.0.40
codegen_flags: <defaults>
</compile_context>

<pallas_src>
import jax
import jax.numpy as jnp
from jax.experimental import pallas as pl
from jax.experimental.pallas import tpu as pltpu

_LANE = 128


def _cdiv(a, b):
    return (a + b - 1) // b


def _round_up(v, m):
    return _cdiv(v, m) * m


def _vmem_caps():
    """Generation-aware (capacity, vmem_limit, per-step tile budget) in bytes."""
    try:
        cap = int(pltpu.get_tpu_info().vmem_capacity_bytes)
    except Exception:
        cap = 64 * 1024 * 1024  # conservative (v7x-sized) fallback
    vmem_limit = min(cap // 2, 64 * 1024 * 1024)   # 64 MiB v5e/v6e, 32 MiB v7x
    tile_budget = (vmem_limit * 3) // 4            # 48 MiB v5e/v6e, 24 MiB v7x
    return cap, vmem_limit, tile_budget


def _stream_tile_bytes(c8, thw, isz):
    # 2x double-buffered input + 2x double-buffered output tiles, plus ~2 f32
    # (C, THW) in-kernel temporaries (sSE product / broadcast gate).
    return 4 * c8 * thw * isz + 2 * c8 * thw * 4


def _resident_tile_bytes(c8, hw, isz):
    hw_pad = _round_up(hw, _LANE)  # lane padding in VMEM layout
    # in + out double-buffered, plus ~3 f32 temporaries (f32 copy, gate, prod).
    return 4 * c8 * hw_pad * isz + 3 * c8 * hw_pad * 4


def _pick_spatial_tile(n, c8, hw, isz, tile_budget):
    """Lane-dense spatial tile: big enough to amortize the ~0.35us/step cost,
    small enough for the VMEM budget, and leaving >= 2 grid steps for v7x."""
    hw_pad = _round_up(hw, _LANE)
    per_col = 4 * c8 * isz + 2 * c8 * 4                     # bytes per THW unit
    max_budget = max(_LANE, tile_budget // per_col)
    target = max(_LANE, (4 * 1024 * 1024) // (c8 * isz))    # ~4 MiB input block
    thw = min(max_budget, target, 16 * 1024, hw_pad)
    thw = max(_LANE, (thw // _LANE) * _LANE)
    # v7x has 2 TensorCores; make sure the parallel grid has >= 2 steps.
    if n * _cdiv(hw, thw) < 2 and hw > _LANE:
        thw = max(_LANE, _round_up(_cdiv(hw, 2), _LANE))
    return thw


# --------------------------------------------------------------------------
# Kernels
# --------------------------------------------------------------------------
def scse_stream_kernel(x_ref, cse_ref, ws_ref, bs_ref, o_ref):
    # x_ref block:   (1, C, THW)  input dtype (f32 or bf16)
    # cse_ref block: (1, C, 1)    f32 channel gate (precomputed in JAX)
    # ws_ref block:  (C, 1)       f32 sSE 1x1-conv weights
    # bs_ref:        (1,) SMEM    f32 sSE bias
    x = x_ref[0]                                            # (C, THW), in dtype
    cse = cse_ref[0]                                        # (C, 1) f32
    ws = ws_ref[...]                                        # (C, 1) f32
    bs = bs_ref[0]

    # sSE: per-pixel 1x1 conv C -> 1; accumulate in f32, VPU mul + XLU reduce.
    sse_logit = jnp.sum(ws * x.astype(jnp.float32), axis=0, keepdims=True) + bs
    sse = jax.nn.sigmoid(sse_logit)                         # (1, THW) f32

    # Fused combine x*cSE + x*sSE == x * (cSE + sSE).  Keep the dominant
    # multiply in the input dtype (bf16 stays bf16 on v6e/v7x).
    gate = (cse + sse).astype(x.dtype)                      # (C, THW)
    o_ref[0] = (x * gate).astype(o_ref.dtype)


def _make_resident_kernel(inv_hw):
    def kernel(x_ref, w1t_ref, b1_ref, w2_ref, b2_ref, ws_ref, bs_ref, o_ref):
        # x_ref block: (1, C, HW) input dtype; weights are tiny f32 VMEM blocks.
        x = x_ref[0]                                        # (C, HW)
        xf = x.astype(jnp.float32)

        # Global average pool (per channel) -> (C, 1).
        s = jnp.sum(xf, axis=1, keepdims=True) * inv_hw

        # cSE squeeze-excite, as VPU multiplies + XLU reduces (no MXU,
        # no transposes; FLOPs are negligible):
        #   z1  = relu(W1 @ s + b1)   with W1^T stored as (C, Cmid)
        #   cse = sigmoid(W2 @ z1 + b2)
        z1 = jnp.maximum(
            jnp.sum(w1t_ref[...] * s, axis=0, keepdims=True) + b1_ref[...], 0.0
        )                                                   # (1, Cmid)
        cse = jax.nn.sigmoid(
            jnp.sum(w2_ref[...] * z1, axis=1, keepdims=True) + b2_ref[...]
        )                                                   # (C, 1)

        # sSE: per-pixel 1x1 conv C -> 1 (f32 accumulation).
        sse = jax.nn.sigmoid(
            jnp.sum(ws_ref[...] * xf, axis=0, keepdims=True) + bs_ref[0]
        )                                                   # (1, HW)

        gate = (cse + sse).astype(x.dtype)                  # (C, HW)
        o_ref[0] = (x * gate).astype(o_ref.dtype)
    return kernel


# --------------------------------------------------------------------------
# Wrapper
# --------------------------------------------------------------------------
def scse_forward(x_nchw, params, *, force_streaming=False, thw_override=None):
    """x_nchw: (N, C, H, W), f32 or bf16.  Returns same shape/dtype."""
    w1, b1, w2, b2, ws, bs = params
    n, c, h, w = x_nchw.shape
    hw = h * w
    out_dtype = x_nchw.dtype
    isz = jnp.dtype(out_dtype).itemsize
    c8 = _round_up(c, 8)

    cap, vmem_limit, tile_budget = _vmem_caps()

    x_flat = x_nchw.reshape(n, c, hw)                       # free (contiguous)
    ws_col = ws.reshape(c, 1).astype(jnp.float32)           # (C, 1)
    bs_vec = bs.reshape(1).astype(jnp.float32)              # (1,) -> SMEM

    use_resident = (not force_streaming) and (
        _resident_tile_bytes(c8, hw, isz) <= tile_budget)

    if use_resident:
        # ---- single-pass fused kernel: 1 read + 1 write of x ----
        c_mid = w1.shape[0]
        w1t = jnp.asarray(w1, jnp.float32).T                # (C, Cmid)
        b1_row = jnp.asarray(b1, jnp.float32).reshape(1, c_mid)
        w2f = jnp.asarray(w2, jnp.float32)                  # (C, Cmid)
        b2_col = jnp.asarray(b2, jnp.float32).reshape(c, 1)

        out = pl.pallas_call(
            _make_resident_kernel(1.0 / float(hw)),
            out_shape=jax.ShapeDtypeStruct((n, c, hw), out_dtype),
            grid_spec=pltpu.PrefetchScalarGridSpec(
                num_scalar_prefetch=0,
                grid=(n,),
                in_specs=[
                    pl.BlockSpec((1, c, hw), lambda i: (i, 0, 0)),      # x slab
                    pl.BlockSpec((c, c_mid), lambda i: (0, 0)),         # W1^T
                    pl.BlockSpec((1, c_mid), lambda i: (0, 0)),         # b1
                    pl.BlockSpec((c, c_mid), lambda i: (0, 0)),         # W2
                    pl.BlockSpec((c, 1), lambda i: (0, 0)),             # b2
                    pl.BlockSpec((c, 1), lambda i: (0, 0)),             # Ws
                    pl.BlockSpec(memory_space=pltpu.MemorySpace.SMEM),  # bs
                ],
                out_specs=pl.BlockSpec((1, c, hw), lambda i: (i, 0, 0)),
            ),
            compiler_params=pltpu.CompilerParams(
                dimension_semantics=("parallel",),
                vmem_limit_bytes=int(vmem_limit),
            ),
        )(x_flat, w1t, b1_row, w2f, b2_col, ws_col, bs_vec)
        return out.reshape(n, c, h, w)

    # ---- streaming path: cSE hoisted to JAX (one extra fused read of x) ----
    s = jnp.mean(x_flat.astype(jnp.float32), axis=2)        # (N, C)
    z1 = jnp.maximum(s @ w1.T + b1[:, 0], 0.0)              # (N, Cmid)
    cse_gate = jax.nn.sigmoid(z1 @ w2.T + b2[:, 0])         # (N, C)
    cse_gate = cse_gate[:, :, None].astype(jnp.float32)     # (N, C, 1)

    if thw_override is not None:
        thw = int(thw_override)
        assert thw % _LANE == 0, "thw_override must be a multiple of 128"
    else:
        thw = _pick_spatial_tile(n, c8, hw, isz, tile_budget)

    # Make sure the declared VMEM limit covers the real footprint (large-C
    # safety; the 128-lane floor can exceed the default budget).
    # TODO(synk): for very wide channel counts, tile C with an f32 sSE
    # partial-sum scratch instead of just raising the limit.
    need = _stream_tile_bytes(c8, thw, isz) + (2 << 20)
    vmem_limit = min(cap, max(vmem_limit, need))

    # NO padding / slicing passes over HBM: the partial last spatial block is
    # handled by Pallas (garbage tail lanes are per-lane only; stores masked).
    grid = (n, _cdiv(hw, thw))

    out = pl.pallas_call(
        scse_stream_kernel,
        out_shape=jax.ShapeDtypeStruct((n, c, hw), out_dtype),
        grid_spec=pltpu.PrefetchScalarGridSpec(
            num_scalar_prefetch=0,
            grid=grid,
            in_specs=[
                pl.BlockSpec((1, c, thw), lambda i, j: (i, 0, j)),      # x tile
                pl.BlockSpec((1, c, 1), lambda i, j: (i, 0, 0)),        # cSE
                pl.BlockSpec((c, 1), lambda i, j: (0, 0)),              # Ws
                pl.BlockSpec(memory_space=pltpu.MemorySpace.SMEM),      # bs
            ],
            out_specs=pl.BlockSpec((1, c, thw), lambda i, j: (i, 0, j)),
        ),
        compiler_params=pltpu.CompilerParams(
            dimension_semantics=("parallel", "parallel"),
            vmem_limit_bytes=int(vmem_limit),
        ),
    )(x_flat, cse_gate, ws_col, bs_vec)

    return out.reshape(n, c, h, w)


# --------------------------------------------------------------------------
# Params / reference / test
# --------------------------------------------------------------------------
def make_params(key, in_channels, reduction=16):
    c_mid = in_channels // reduction
    k1, k2, k3, k4, k5, k6 = jax.random.split(key, 6)
    # 1x1 conv weights stored as plain matrices (out, in); biases as columns.
    w1 = jax.random.normal(k1, (c_mid, in_channels), jnp.float32) * 0.1
    b1 = jax.random.normal(k2, (c_mid, 1), jnp.float32) * 0.1
    w2 = jax.random.normal(k3, (in_channels, c_mid), jnp.float32) * 0.1
    b2 = jax.random.normal(k4, (in_channels, 1), jnp.float32) * 0.1
    ws = jax.random.normal(k5, (1, in_channels), jnp.float32) * 0.1
    bs = jax.random.normal(k6, (1, 1), jnp.float32) * 0.1
    return (w1, b1, w2, b2, ws, bs)


def scse_reference(x_nchw, params):
    """Pure-JAX reference matching the PyTorch forward."""
    w1, b1, w2, b2, ws, bs = params
    s = jnp.mean(x_nchw, axis=(2, 3))                            # (N, C)
    z1 = jnp.maximum(s @ w1.T + b1[:, 0], 0.0)                   # (N, Cmid)
    cse = jax.nn.sigmoid(z1 @ w2.T + b2[:, 0])                   # (N, C)
    sse = jax.nn.sigmoid(
        jnp.einsum('nchw,c->nhw', x_nchw, ws[0]) + bs[0, 0])     # (N, H, W)
    return (x_nchw * cse[:, :, None, None]
            + x_nchw * sse[:, None, :, :])


if __name__ == "__main__":
    key = jax.random.PRNGKey(0)
    kx, kp, kx2 = jax.random.split(key, 3)

    N, C, H, W = 2, 32, 16, 16          # reduction=16 -> C_mid = 2
    x = jax.random.normal(kx, (N, C, H, W), jnp.float32)
    params = make_params(kp, C, reduction=16)

    scse = jax.jit(scse_forward, static_argnames=("force_streaming", "thw_override"))

    # 1) f32, fused single-pass (resident) path
    out = jax.block_until_ready(scse(x, params))
    ref = scse_reference(x, params)
    assert out.shape == (N, C, H, W)
    assert jnp.allclose(out, ref, atol=2e-5, rtol=2e-5), "f32 resident mismatch"

    # 2) bf16, resident path (narrow multiply, f32 accumulation)
    x_bf16 = x.astype(jnp.bfloat16)
    out_bf16 = jax.block_until_ready(scse(x_bf16, params))
    ref_bf16 = scse_reference(x_bf16.astype(jnp.float32), params)
    assert out_bf16.dtype == jnp.bfloat16
    assert jnp.allclose(out_bf16.astype(jnp.float32), ref_bf16,
                        atol=5e-2, rtol=5e-2), "bf16 resident mismatch"

    # 3) H*W not a multiple of 128 (14x14 = 196), resident path
    x2 = jax.random.normal(kx2, (N, C, 14, 14), jnp.float32)
    out2 = jax.block_until_ready(scse(x2, params))
    ref2 = scse_reference(x2, params)
    assert jnp.allclose(out2, ref2, atol=2e-5, rtol=2e-5), "ragged resident mismatch"

    # 4) Forced streaming path with a partial last spatial block (no HBM pad/slice)
    out3 = jax.block_until_ready(
        scse(x2, params, force_streaming=True, thw_override=128))
    assert jnp.allclose(out3, ref2, atol=2e-5, rtol=2e-5), "streaming partial-block mismatch"

    # 5) Forced streaming, bf16, partial last block
    x2_bf16 = x2.astype(jnp.bfloat16)
    out4 = jax.block_until_ready(
        scse(x2_bf16, params, force_streaming=True, thw_override=128))
    ref4 = scse_reference(x2_bf16.astype(jnp.float32), params)
    assert out4.dtype == jnp.bfloat16
    assert jnp.allclose(out4.astype(jnp.float32), ref4,
                        atol=5e-2, rtol=5e-2), "streaming bf16 mismatch"

    print("KERNEL_OK")
</pallas_src>

<mosaic_0001>
module attributes {stable_mosaic.version = 11 : i64} {
  func.func @kernel(%arg0: i32, %arg1: memref<1x32x256xf32, #tpu.memory_space<vmem>>, %arg2: memref<32x2xf32, #tpu.memory_space<vmem>>, %arg3: memref<1x2xf32, #tpu.memory_space<vmem>>, %arg4: memref<32x2xf32, #tpu.memory_space<vmem>>, %arg5: memref<32x1xf32, #tpu.memory_space<vmem>>, %arg6: memref<32x1xf32, #tpu.memory_space<vmem>>, %arg7: memref<1xf32, #tpu.memory_space<smem>>, %arg8: memref<1x32x256xf32, #tpu.memory_space<vmem>>) attributes {dimension_semantics = [#tpu.dimension_semantics<parallel>], iteration_bounds = array<i64: 2>, scalar_prefetch = 0 : i64, scratch_operands = 0 : i64, tpu.core_type = #tpu.core_type<tc>, window_params = [{transform_indices = @transform_0, window_bounds = array<i64: 1, 32, 256>}, {pipeline_mode = #tpu.pipeline_mode<synchronous>, transform_indices = @transform_1, window_bounds = array<i64: 32, 2>}, {pipeline_mode = #tpu.pipeline_mode<synchronous>, transform_indices = @transform_2, window_bounds = array<i64: 1, 2>}, {pipeline_mode = #tpu.pipeline_mode<synchronous>, transform_indices = @transform_3, window_bounds = array<i64: 32, 2>}, {pipeline_mode = #tpu.pipeline_mode<synchronous>, transform_indices = @transform_4, window_bounds = array<i64: 32, 1>}, {pipeline_mode = #tpu.pipeline_mode<synchronous>, transform_indices = @transform_5, window_bounds = array<i64: 32, 1>}, {transform_indices = @transform_6, window_bounds = array<i64: 1>}, {transform_indices = @transform_7, window_bounds = array<i64: 1, 32, 256>}]} {
    %c0 = arith.constant 0 : index
    %c0_0 = arith.constant 0 : index
    %c0_1 = arith.constant 0 : index
    %0 = vector.load %arg1[%c0, %c0_0, %c0_1] : memref<1x32x256xf32, #tpu.memory_space<vmem>>, vector<1x32x256xf32>
    %1 = vector.shape_cast %0 : vector<1x32x256xf32> to vector<32x256xf32>
    %cst = arith.constant dense<0.000000e+00> : vector<32xf32>
    %2 = vector.multi_reduction <add>, %1, %cst [1] : vector<32x256xf32> to vector<32xf32>
    %3 = vector.shape_cast %2 : vector<32xf32> to vector<32x1xf32>
    %cst_2 = arith.constant 3.906250e-03 : f32
    %4 = vector.broadcast %cst_2 : f32 to vector<32x1xf32>
    %5 = arith.mulf %3, %4 : vector<32x1xf32>
    %c0_3 = arith.constant 0 : index
    %c0_4 = arith.constant 0 : index
    %6 = vector.load %arg2[%c0_3, %c0_4] : memref<32x2xf32, #tpu.memory_space<vmem>>, vector<32x2xf32>
    %7 = vector.broadcast %5 : vector<32x1xf32> to vector<32x2xf32>
    %8 = arith.mulf %6, %7 : vector<32x2xf32>
    %cst_5 = arith.constant dense<0.000000e+00> : vector<2xf32>
    %9 = vector.multi_reduction <add>, %8, %cst_5 [0] : vector<32x2xf32> to vector<2xf32>
    %10 = vector.shape_cast %9 : vector<2xf32> to vector<1x2xf32>
    %c0_6 = arith.constant 0 : index
    %c0_7 = arith.constant 0 : index
    %11 = vector.load %arg3[%c0_6, %c0_7] : memref<1x2xf32, #tpu.memory_space<vmem>>, vector<1x2xf32>
    %12 = arith.addf %10, %11 : vector<1x2xf32>
    %cst_8 = arith.constant 0.000000e+00 : f32
    %13 = vector.broadcast %cst_8 : f32 to vector<1x2xf32>
    %14 = arith.maximumf %12, %13 : vector<1x2xf32>
    %c0_9 = arith.constant 0 : index
    %c0_10 = arith.constant 0 : index
    %15 = vector.load %arg4[%c0_9, %c0_10] : memref<32x2xf32, #tpu.memory_space<vmem>>, vector<32x2xf32>
    %16 = vector.broadcast %14 : vector<1x2xf32> to vector<32x2xf32>
    %17 = arith.mulf %15, %16 : vector<32x2xf32>
    %cst_11 = arith.constant dense<0.000000e+00> : vector<32xf32>
    %18 = vector.multi_reduction <add>, %17, %cst_11 [1] : vector<32x2xf32> to vector<32xf32>
    %19 = vector.shape_cast %18 : vector<32xf32> to vector<32x1xf32>
    %c0_12 = arith.constant 0 : index
    %c0_13 = arith.constant 0 : index
    %20 = vector.load %arg5[%c0_12, %c0_13] : memref<32x1xf32, #tpu.memory_space<vmem>>, vector<32x1xf32>
    %21 = arith.addf %19, %20 : vector<32x1xf32>
    %22 = arith.negf %21 : vector<32x1xf32>
    %23 = math.exp %22 : vector<32x1xf32>
    %cst_14 = arith.constant 1.000000e+00 : f32
    %24 = vector.broadcast %cst_14 : f32 to vector<32x1xf32>
    %25 = arith.addf %24, %23 : vector<32x1xf32>
    %26 = arith.divf %24, %25 : vector<32x1xf32>
    %c0_15 = arith.constant 0 : index
    %c0_16 = arith.constant 0 : index
    %27 = vector.load %arg6[%c0_15, %c0_16] : memref<32x1xf32, #tpu.memory_space<vmem>>, vector<32x1xf32>
    %28 = vector.broadcast %27 : vector<32x1xf32> to vector<32x256xf32>
    %29 = arith.mulf %28, %1 : vector<32x256xf32>
    %cst_17 = arith.constant dense<0.000000e+00> : vector<256xf32>
    %30 = vector.multi_reduction <add>, %29, %cst_17 [0] : vector<32x256xf32> to vector<256xf32>
    %31 = vector.shape_cast %30 : vector<256xf32> to vector<1x256xf32>
    %c0_18 = arith.constant 0 : index
    %32 = memref.load %arg7[%c0_18] : memref<1xf32, #tpu.memory_space<smem>>
    %33 = vector.broadcast %32 : f32 to vector<1x256xf32>
    %34 = arith.addf %31, %33 : vector<1x256xf32>
    %35 = arith.negf %34 : vector<1x256xf32>
    %36 = math.exp %35 : vector<1x256xf32>
    %cst_19 = arith.constant 1.000000e+00 : f32
    %37 = vector.broadcast %cst_19 : f32 to vector<1x256xf32>
    %38 = arith.addf %37, %36 : vector<1x256xf32>
    %39 = arith.divf %37, %38 : vector<1x256xf32>
    %40 = vector.broadcast %26 : vector<32x1xf32> to vector<32x256xf32>
    %41 = vector.broadcast %39 : vector<1x256xf32> to vector<32x256xf32>
    %42 = arith.addf %40, %41 : vector<32x256xf32>
    %43 = arith.mulf %1, %42 : vector<32x256xf32>
    %c0_20 = arith.constant 0 : index
    %c0_21 = arith.constant 0 : index
    %c0_22 = arith.constant 0 : index
    %44 = vector.load %arg8[%c0_20, %c0_21, %c0_22] : memref<1x32x256xf32, #tpu.memory_space<vmem>>, vector<1x32x256xf32>
    %45 = vector.shape_cast %44 : vector<1x32x256xf32> to vector<32x256xf32>
    %46 = vector.shape_cast %43 : vector<32x256xf32> to vector<1x32x256xf32>
    tpu.vector_store %arg8[%c0_20, %c0_21, %c0_22], %46 {strides = array<i32>} : memref<1x32x256xf32, #tpu.memory_space<vmem>>, vector<1x32x256xf32>,
    return
  }
  func.func @transform_0(%arg0: i32) -> (i32, i32, i32) {
    %c0_i32 = arith.constant 0 : i32
    %c0_i32_0 = arith.constant 0 : i32
    %c0_i32_1 = arith.constant 0 : i32
    return %arg0, %c0_i32, %c0_i32_0 : i32, i32, i32
  }
  func.func @transform_1(%arg0: i32) -> (i32, i32) {
    %c0_i32 = arith.constant 0 : i32
    %c0_i32_0 = arith.constant 0 : i32
    %c0_i32_1 = arith.constant 0 : i32
    return %c0_i32, %c0_i32_0 : i32, i32
  }
  func.func @transform_2(%arg0: i32) -> (i32, i32) {
    %c0_i32 = arith.constant 0 : i32
    %c0_i32_0 = arith.constant 0 : i32
    %c0_i32_1 = arith.constant 0 : i32
    return %c0_i32, %c0_i32_0 : i32, i32
  }
  func.func @transform_3(%arg0: i32) -> (i32, i32) {
    %c0_i32 = arith.constant 0 : i32
    %c0_i32_0 = arith.constant 0 : i32
    %c0_i32_1 = arith.constant 0 : i32
    return %c0_i32, %c0_i32_0 : i32, i32
  }
  func.func @transform_4(%arg0: i32) -> (i32, i32) {
    %c0_i32 = arith.constant 0 : i32
    %c0_i32_0 = arith.constant 0 : i32
    %c0_i32_1 = arith.constant 0 : i32
    return %c0_i32, %c0_i32_0 : i32, i32
  }
  func.func @transform_5(%arg0: i32) -> (i32, i32) {
    %c0_i32 = arith.constant 0 : i32
    %c0_i32_0 = arith.constant 0 : i32
    %c0_i32_1 = arith.constant 0 : i32
    return %c0_i32, %c0_i32_0 : i32, i32
  }
  func.func @transform_6(%arg0: i32) -> i32 {
    %c0_i32 = arith.constant 0 : i32
    %c0_i32_0 = arith.constant 0 : i32
    return %c0_i32 : i32
  }
  func.func @transform_7(%arg0: i32) -> (i32, i32, i32) {
    %c0_i32 = arith.constant 0 : i32
    %c0_i32_0 = arith.constant 0 : i32
    %c0_i32_1 = arith.constant 0 : i32
    return %arg0, %c0_i32, %c0_i32_0 : i32, i32, i32
  }
}

</mosaic_0001>

<bundles_post_ra>
// kernel: scse_forward.1
= control target key start
LH: loop header
LB: loop body
LE: loop exit
PB: predicated region body
PF: predicated region fallthrough
CT: control target
= control target key end

     0   :  { %s732_s26 = smov 0   ;;  %s879_s0 = inlined_call_operand.vmem [shape: f32[2,32,256], index: 0, kind: input, shape index: {}]   ;;  %s880_s1 = inlined_call_operand.vmem [shape: f32[32,2], index: 1, kind: input, shape index: {}]   ;;  %s881_s2 = inlined_call_operand.vmem [shape: f32[1,2], index: 2, kind: input, shape index: {}]   ;;  %s882_s3 = inlined_call_operand.vmem [shape: f32[32,2], index: 3, kind: input, shape index: {}]   ;;  %s883_s4 = inlined_call_operand.vmem [shape: f32[32,1], index: 4, kind: input, shape index: {}]   ;;  %s884_s5 = inlined_call_operand.vmem [shape: f32[32,1], index: 5, kind: input, shape index: {}]   ;;  %s885_s6 = inlined_call_operand.<no memory space> [shape: f32[1], index: 6, kind: input, shape index: {}]   ;;  %s886_s7 = inlined_call_operand.vmem [shape: f32[2,32,256], index: 7, kind: output, shape index: {}]  }
   0x1   :  { %12 = sst [smem:[#allocation2]] %s885_s6 }
   0x2 LB: > { %s625_s27 = sadd.s32 4294967295, %s686_s26   ;;  %p629_p0 = scmp.ge.s32.totalorder %s686_s26, 1  ;;  %s686_s26 = sphi %s732_s26, %s18_s26  }
   0x3   : > { %p238_p1 = scmp.lt.s32.totalorder %s686_s26, 3 }
   0x5   : > { %p239_p2 = pnand %p629_p0, %p238_p1 }
   0x6   : > { %p270_p3 = scmp.lt.s32.totalorder (!%p239_p2), %s625_s27, 1  ;;  %s484_s21 = sld [smem:[#allocation2]] (!%p239_p2) }
   0x7   : > { %242 = sbr.rel (%p239_p2) target bundleno = 460 (0x1cc), region = 48 }
   0xc   : > { %v434_v0 = vld [vmem:[%s884_s5] sm:$0xff]  ;;  %v688_v1 = vmov 0   ;;  %s890_s27 = smov (!%p270_p3, %s625_s27), 1  ;;  %v306_v19 = vld [vmem:[%s880_s1 + $0x10] sm:$0xff]  ;;  %v305_v20 = vld [vmem:[%s880_s1 + $0x8] sm:$0xff]  ;;  %vm312_vm0 = vcmask 15360  }
   0xd   : > { %653 = vset.pattern.permute.xlu2 %v688_v1  ;;  %654 = vset.pattern.permute.xlu0 %v688_v1  ;;  %s642_s6 = sshll.u32 %s890_s27, 6  ;;  %v304_v17 = vld [vmem:[%s880_s1] sm:$0xff]  ;;  %v307_v24 = vld [vmem:[%s880_s1 + $0x18] sm:$0xff]  ;;  %v331_v47 = vld [vmem:[%s882_s3 + $0x10] sm:$0xff] }
   0xe   : > { %440 = vperm.xlu2 %653, %v434_v0   ;;  %655 = vset.pattern.permute.xlu1 %v688_v1  ;;  %s274_s9 = scalar_lea.vmem %s879_s0, %s642_s6  ;;  %v326_v42 = vld [vmem:[%s881_s2] sm:$0x1]  ;;  %v332_v46 = vld [vmem:[%s882_s3 + $0x18] sm:$0xff]  ;;  %v330_v56 = vld [vmem:[%s882_s3 + $0x8] sm:$0xff]  ;;  %s279_s24 = scalar_lea.vmem %s886_s7, %s642_s6 }
   0xf   : > { %v751_v2 = vld [vmem:[%s274_s9] sm:$0xff]  ;;  %v753_v3 = vld [vmem:[%s274_s9 + $0x8] sm:$0xff]  ;;  %v763_v8 = vld [vmem:[%s274_s9 + $0x10] sm:$0xff] }
  0x10   : > { %v755_v4 = vld [vmem:[%s274_s9 + $0x20] sm:$0xff]  ;;  %v288_v5 = vadd.f32 %v753_v3, %v751_v2  ;;  %v759_v6 = vld [vmem:[%s274_s9 + $0x28] sm:$0xff]  ;;  %v765_v9 = vld [vmem:[%s274_s9 + $0x18] sm:$0xff] }
  0x11   : > { %v294_v7 = vadd.f32 %v759_v6, %v755_v4  ;;  %v767_v10 = vld [vmem:[%s274_s9 + $0x30] sm:$0xff]  ;;  %v769_v11 = vld [vmem:[%s274_s9 + $0x38] sm:$0xff]  ;;  %v291_v12 = vadd.f32 %v765_v9, %v763_v8  ;;  %v329_v48 = vld [vmem:[%s882_s3] sm:$0xff] }
  0x12   : > { %289 = vadd.xlane.f32.xlu0 %v288_v5  ;;  %v297_v13 = vadd.f32 %v769_v11, %v767_v10  ;;  %v435_v59 = vld [vmem:[%s884_s5 + $0x8] sm:$0xff]  ;;  %v436_v60 = vld [vmem:[%s884_s5 + $0x10] sm:$0xff]  ;;  %v437_v61 = vld [vmem:[%s884_s5 + $0x18] sm:$0xff] }
  0x13   : > { %295 = vadd.xlane.f32.xlu1 %v294_v7  ;;  %v353_v63 = vld [vmem:[%s883_s4 + $0x18] sm:$0xff]  ;;  %v352_v0 = vld [vmem:[%s883_s4 + $0x10] sm:$0xff]  ;;  %v350_v1 = vld [vmem:[%s883_s4] sm:$0xff] }
  0x1a   : > { %292 = vadd.xlane.f32.xlu0 %v291_v12 }
  0x1b   : > { %298 = vadd.xlane.f32.xlu1 %v297_v13 }
  0x68   : > { %v819_v62 = vpop.permute.xlu2 %440 }
  0x85   : > { %v290_v14 = vpop.xlane.xlu0 %289 }
  0x86   : > { %v296_v15 = vpop.xlane.xlu1 %295  ;;  %v300_v16 = vmul.f32 0.00390625, %v290_v14 }
  0x87   : > { %v302_v18 = vmul.f32 0.00390625, %v296_v15 }
  0x88   : > { %v308_v22 = vmul.f32 %v304_v17, %v300_v16 }
  0x89   : > { %v310_v27 = vmul.f32 %v306_v19, %v302_v18  ;;  %v351_v19 = vld [vmem:[%s883_s4 + $0x8] sm:$0xff] }
  0x8a   : > { %v313_v30 = vsel %vm312_vm0, %v308_v22, 0.0 }
  0x8b   : > { %v316_v33 = vsel %vm312_vm0, %v310_v27, 0.0 }
  0x8d   : > { %v293_v21 = vpop.xlane.xlu0 %292 }
  0x8e   : > { %v301_v23 = vmul.f32 0.00390625, %v293_v21  ;;  %v299_v25 = vpop.xlane.xlu1 %298 }
  0x8f   : > { %v303_v26 = vmul.f32 0.00390625, %v299_v25 }
  0x90   : > { %v309_v28 = vmul.f32 %v305_v20, %v301_v23 }
  0x91   : > { %v311_v29 = vmul.f32 %v307_v24, %v303_v26 }
  0x92   : > { %v314_v31 = vsel %vm312_vm0, %v309_v28, 0.0 }
  0x93   : > { %v315_v32 = vadd.f32 %v314_v31, %v313_v30  ;;  %v318_v34 = vsel %vm312_vm0, %v311_v29, 0.0 }
  0x95   : > { %v317_v35 = vadd.f32 %v316_v33, %v315_v32 }
  0x97   : > { %v319_v36 = vadd.f32 %v318_v34, %v317_v35 }
  0x99   : > { %v320_v37 = vrot.slane %v319_v36, 4 }
  0x9b   : > { %v321_v38 = vadd.f32 %v320_v37, %v319_v36 }
  0x9d   : > { %v322_v39 = vrot.slane %v321_v38, 2 }
  0x9f   : > { %v323_v40 = vadd.f32 %v322_v39, %v321_v38 }
  0xa1   : > { %v324_v41 = vrot.slane %v323_v40, 1 }
  0xa3   : > { %v325_v43 = vadd.f32 %v324_v41, %v323_v40 }
  0xa5   : > { %v327_v44 = vadd.f32 %v326_v42, %v325_v43 }
  0xa7   : > { %v328_v45 = vmax.f32 %v327_v44, 0.0 }
  0xa9   : > { %v333_v49 = vperm.slane %v328_v45, 0 }
  0xab   : > { %v337_v50 = vmul.f32 %v333_v49, %v332_v46  ;;  %v336_v51 = vmul.f32 %v333_v49, %v331_v47  ;;  %v334_v52 = vmul.f32 %v333_v49, %v329_v48  ;;  %v335_v57 = vmul.f32 %v333_v49, %v330_v56 }
  0xad   : > { %v347_v53 = vsel %vm312_vm0, %v337_v50, 0.0  ;;  %v344_v54 = vsel %vm312_vm0, %v336_v51, 0.0  ;;  %v338_v55 = vsel %vm312_vm0, %v334_v52, 0.0  ;;  %v341_v58 = vsel %vm312_vm0, %v335_v57, 0.0 }
  0xae   : > { %348 = vadd.xlane.f32.xlu1 %v347_v53  ;;  %345 = vadd.xlane.f32.xlu0 %v344_v54  ;;  %v458_v57 = vmul.f32 %v819_v62, %v751_v2 }
  0xaf   : > { %339 = vadd.xlane.f32.xlu2 %v338_v55 }
  0xb7   : > { %342 = vadd.xlane.f32.xlu2 %v341_v58 }
  0xc2   : > { %445 = vperm.xlu0 %654, %v435_v59  }
  0xc7   : > { %450 = vperm.xlu1 %655, %v436_v60  }
  0xcf   : > { %455 = vperm.xlu2 %653, %v437_v61  }
 0x121   : > { %v349_v5 = vpop.xlane.xlu1 %348  ;;  %v346_v7 = vpop.xlane.xlu0 %345 }
 0x122   : > { %v357_v12 = vadd.f32 %v353_v63, %v349_v5  ;;  %v356_v13 = vadd.f32 %v352_v0, %v346_v7  ;;  %v340_v14 = vpop.xlane.xlu2 %339  ;;  %v459_v5 = vmul.f32 %v819_v62, %v753_v3 }
 0x123   : > { %v354_v15 = vadd.f32 %v350_v1, %v340_v14 }
 0x124   : > { %v636_v16 = vmul.f32 -1.442695, %v356_v13  ;;  %v637_v18 = vmul.f32 -1.442695, %v357_v12 }
 0x125   : > { %v634_v17 = vmul.f32 -1.442695, %v354_v15 }
 0x126   : > { %656 = vpow2.f32 %v636_v16 }
 0x127   : > { %658 = vpow2.f32 %v634_v17 }
 0x128   : > { %660 = vpow2.f32 %v637_v18 }
 0x12a   : > { %v343_v20 = vpop.xlane.xlu2 %342 }
 0x12b   : > { %v355_v21 = vadd.f32 %v351_v19, %v343_v20 }
 0x12c   : > { %v657_v22 = vpop.eup %656 }
 0x12d   : > { %v659_v23 = vpop.eup %658  ;;  %v372_v24 = vadd.f32 1.0, %v657_v22  ;;  %v635_v25 = vmul.f32 -1.442695, %v355_v21 }
 0x12e   : > { %v370_v26 = vadd.f32 1.0, %v659_v23  ;;  %v661_v27 = vpop.eup %660 }
 0x12f   : > { %662 = vrcp.f32 %v372_v24  ;;  %v833_v28 = vadd.f32 1.0, %v661_v27  ;;  %v413_v52 = vand.u32 2147483647, %v372_v24  ;;  %v415_v53 = vand.u32 2147483648, %v372_v24 }
 0x130   : > { %664 = vrcp.f32 %v370_v26  ;;  %v385_v37 = vand.u32 2147483648, %v370_v26  ;;  %v383_v39 = vand.u32 2147483647, %v370_v26  ;;  %vm379_vm2 = vweird.f32 %v370_v26 }
 0x131   : > { %666 = vpow2.f32 %v635_v25  ;;  %vm409_vm6 = vweird.f32 %v372_v24  ;;  %vm414_vm9 = vcmp.eq.f32.partialorder %v413_v52, 8.507059e+37  ;;  %v416_v12 = vor.u32 1.1754944e-38, %v415_v53 }
 0x132   : > { %668 = vrcp.f32 %v833_v28  ;;  %v386_v43 = vor.u32 1.1754944e-38, %v385_v37  ;;  %vm384_vm4 = vcmp.eq.f32.partialorder %v383_v39, 8.507059e+37  ;;  %v456_v16 = vpop.permute.xlu2 %455  ;;  %vm424_vm14 = vweird.f32 %v833_v28 }
 0x133   : > { %v464_v23 = vmul.f32 %v456_v16, %v767_v10  ;;  %v465_v25 = vmul.f32 %v456_v16, %v769_v11 }
 0x134   : > { %v446_v47 = vpop.permute.xlu0 %445 }
 0x135   : > { %v663_v29 = vpop.eup %662  ;;  %v460_v54 = vmul.f32 %v446_v47, %v763_v8  ;;  %v461_v58 = vmul.f32 %v446_v47, %v765_v9 }
 0x136   : > { %v665_v30 = vpop.eup %664  ;;  %v405_v31 = vmul.f32 %v663_v29, %v372_v24  ;;  %vm410_vm5 = vweird.f32 %v663_v29 }
 0x137   : > { %v667_v32 = vpop.eup %666  ;;  %v375_v33 = vmul.f32 %v665_v30, %v370_v26  ;;  %vm380_vm1 = vweird.f32 %v665_v30  ;;  %vm845_vm7 = vmor %vm409_vm6, %vm410_vm5  ;;  %v466_v13 = vadd.f32 %v460_v54, %v458_v57  ;;  %v475_v17 = vadd.f32 %v461_v58, %v459_v5 }
 0x138   : > { %v371_v34 = vadd.f32 1.0, %v667_v32  ;;  %v406_v36 = vsub.f32 1.0, %v405_v31  ;;  %v836_v40 = vpop.eup %668  ;;  %vm381_vm3 = vmor %vm379_vm2, %vm380_vm1  ;;  %v430_v26 = vand.u32 2147483648, %v833_v28 }
 0x139   : > { %v376_v35 = vsub.f32 1.0, %v375_v33  ;;  %v420_v45 = vmul.f32 %v836_v40, %v833_v28  ;;  %v451_v49 = vpop.permute.xlu1 %450  ;;  %vm425_vm13 = vweird.f32 %v836_v40 }
 0x13a   : > { %670 = vrcp.f32 %v371_v34  ;;  %v407_v42 = vmul.f32 %v663_v29, %v406_v36  ;;  %v462_v59 = vmul.f32 %v451_v49, %v755_v4  ;;  %v400_v61 = vand.u32 2147483648, %v371_v34  ;;  %vm426_vm15 = vmor %vm424_vm14, %vm425_vm13 }
 0x13b   : > { %v377_v38 = vmul.f32 %v665_v30, %v376_v35  ;;  %v421_v56 = vsub.f32 1.0, %v420_v45  ;;  %v398_v1 = vand.u32 2147483647, %v371_v34  ;;  %v463_v7 = vmul.f32 %v451_v49, %v759_v6 }
 0x13c   : > { %v408_v50 = vadd.f32 %v663_v29, %v407_v42  ;;  %vm394_vm10 = vweird.f32 %v371_v34  ;;  %v401_v19 = vor.u32 1.1754944e-38, %v400_v61  ;;  %v467_v20 = vadd.f32 %v466_v13, %v462_v59 }
 0x13d   : > { %v378_v41 = vadd.f32 %v665_v30, %v377_v38  ;;  %v422_v15 = vmul.f32 %v836_v40, %v421_v56  ;;  %vm399_vm12 = vcmp.eq.f32.partialorder %v398_v1, 8.507059e+37  ;;  %v476_v22 = vadd.f32 %v475_v17, %v463_v7 }
 0x13e   : > { %v412_v63 = vsel %vm845_vm7, %v663_v29, %v408_v50  ;;  %v468_v27 = vadd.f32 %v467_v20, %v464_v23  ;;  %v428_v29 = vand.u32 2147483647, %v833_v28  ;;  %v431_v32 = vor.u32 1.1754944e-38, %v430_v26 }
 0x13f   : > { %v382_v44 = vsel %vm381_vm3, %v665_v30, %v378_v41  ;;  %v417_v18 = vsel %vm414_vm9, %v416_v12, %v412_v63  ;;  %v423_v24 = vadd.f32 %v836_v40, %v422_v15  ;;  %v477_v30 = vadd.f32 %v476_v22, %v465_v25 }
 0x140   : > { %v671_v46 = vpop.eup %670  ;;  %v387_v48 = vsel %vm384_vm4, %v386_v43, %v382_v44  ;;  %v469_v33 = vrot.slane %v468_v27, 4  ;;  %vm429_vm0 = vcmp.eq.f32.partialorder %v428_v29, 8.507059e+37  ;;  %v485_v45 = vstv %s484_s21 }
 0x141   : > { %528 = vperm.xlu2 %653, %v387_v48   ;;  %v390_v51 = vmul.f32 %v671_v46, %v371_v34  ;;  %vm395_vm8 = vweird.f32 %v671_v46  ;;  %v427_v31 = vsel %vm426_vm15, %v836_v40, %v423_v24  ;;  %v478_v34 = vrot.slane %v477_v30, 4 }
 0x142   : > { %vm396_vm11 = vmor %vm394_vm10, %vm395_vm8  ;;  %v432_v35 = vsel %vm429_vm0, %v431_v32, %v427_v31  ;;  %v470_v36 = vadd.f32 %v469_v33, %v468_v27 }
 0x143   : > { %v391_v55 = vsub.f32 1.0, %v390_v51  ;;  %v479_v37 = vadd.f32 %v478_v34, %v477_v30 }
 0x144   : > { %v471_v38 = vrot.slane %v470_v36, 2 }
 0x145   : > { %v392_v0 = vmul.f32 %v671_v46, %v391_v55  ;;  %v480_v39 = vrot.slane %v479_v37, 2 }
 0x146   : > { %v472_v41 = vadd.f32 %v471_v38, %v470_v36 }
 0x147   : > { %v393_v14 = vadd.f32 %v671_v46, %v392_v0  ;;  %v481_v42 = vadd.f32 %v480_v39, %v479_v37 }
 0x148   : > { %v473_v43 = vrot.slane %v472_v41, 1 }
 0x149   : > { %538 = vperm.xlu2 %653, %v417_v18   ;;  %v397_v21 = vsel %vm396_vm11, %v671_v46, %v393_v14  ;;  %v482_v44 = vrot.slane %v481_v42, 1 }
 0x14a   : > { %v402_v62 = vsel %vm399_vm12, %v401_v19, %v397_v21  ;;  %v474_v28 = vadd.f32 %v473_v43, %v472_v41 }
 0x14b   : > { %533 = vperm.xlu1 %655, %v402_v62   ;;  %v483_v46 = vadd.f32 %v482_v44, %v481_v42 }
 0x14c   : > { %v486_v47 = vadd.f32 %v485_v45, %v474_v28 }
 0x14d   : > { %v487_v40 = vadd.f32 %v485_v45, %v483_v46 }
 0x14e   : > { %v638_v48 = vmul.f32 -1.442695, %v486_v47 }
 0x14f   : > { %v639_v49 = vmul.f32 -1.442695, %v487_v40 }
 0x150   : > { %672 = vpow2.f32 %v638_v48 }
 0x151   : > { %674 = vpow2.f32 %v639_v49 }
 0x153   : > { %543 = vperm.xlu1 %655, %v432_v35  }
 0x156   : > { %v673_v50 = vpop.eup %672 }
 0x157   : > { %v675_v51 = vpop.eup %674  ;;  %v494_v52 = vadd.f32 1.0, %v673_v50 }
 0x158   : > { %v495_v53 = vadd.f32 1.0, %v675_v51 }
 0x159   : > { %676 = vrcp.f32 %v494_v52  ;;  %vm501_vm3 = vweird.f32 %v494_v52  ;;  %v507_v1 = vand.u32 2147483648, %v494_v52  ;;  %v505_v7 = vand.u32 2147483647, %v494_v52 }
 0x15a   : > { %678 = vrcp.f32 %v495_v53  ;;  %v522_v5 = vand.u32 2147483648, %v495_v53  ;;  %vm516_vm5 = vweird.f32 %v495_v53  ;;  %v520_v12 = vand.u32 2147483647, %v495_v53 }
 0x15b   : > { %v508_v15 = vor.u32 1.1754944e-38, %v507_v1  ;;  %vm506_vm7 = vcmp.eq.f32.partialorder %v505_v7, 8.507059e+37 }
 0x15c   : > { %v523_v16 = vor.u32 1.1754944e-38, %v522_v5  ;;  %vm521_vm8 = vcmp.eq.f32.partialorder %v520_v12, 8.507059e+37 }
 0x15f   : > { %v677_v54 = vpop.eup %676 }
 0x160   : > { %v679_v55 = vpop.eup %678  ;;  %v497_v56 = vmul.f32 %v677_v54, %v494_v52  ;;  %vm502_vm1 = vweird.f32 %v677_v54 }
 0x161   : > { %v512_v57 = vmul.f32 %v679_v55, %v495_v53  ;;  %vm517_vm2 = vweird.f32 %v679_v55  ;;  %vm503_vm4 = vmor %vm501_vm3, %vm502_vm1 }
 0x162   : > { %v498_v58 = vsub.f32 1.0, %v497_v56  ;;  %vm518_vm6 = vmor %vm516_vm5, %vm517_vm2 }
 0x163   : > { %v513_v59 = vsub.f32 1.0, %v512_v57 }
 0x164   : > { %v499_v60 = vmul.f32 %v677_v54, %v498_v58 }
 0x165   : > { %v514_v61 = vmul.f32 %v679_v55, %v513_v59 }
 0x166   : > { %v500_v63 = vadd.f32 %v677_v54, %v499_v60 }
 0x167   : > { %v515_v0 = vadd.f32 %v679_v55, %v514_v61 }
 0x168   : > { %v504_v13 = vsel %vm503_vm4, %v677_v54, %v500_v63 }
 0x169   : > { %v519_v14 = vsel %vm518_vm6, %v679_v55, %v515_v0  ;;  %v509_v17 = vsel %vm506_vm7, %v508_v15, %v504_v13 }
 0x16a   : > { %v524_v18 = vsel %vm521_vm8, %v523_v16, %v519_v14 }
 0x19b   : > { %v529_v19 = vpop.permute.xlu2 %528 }
 0x19c   : > { %v546_v20 = vadd.f32 %v529_v19, %v509_v17  ;;  %v547_v21 = vadd.f32 %v529_v19, %v524_v18 }
 0x19e   : > { %v554_v22 = vmul.f32 %v546_v20, %v751_v2  ;;  %v555_v62 = vmul.f32 %v547_v21, %v753_v3 }
 0x1a0   : > { %562 = vst [vmem:[%s279_s24] sm:$0xff] %v554_v22 }
 0x1a1   : > { %563 = vst [vmem:[%s279_s24 + $0x8] sm:$0xff] %v555_v62 }
 0x1a3   : > { %v539_v23 = vpop.permute.xlu2 %538 }
 0x1a4   : > { %v550_v24 = vadd.f32 %v539_v23, %v509_v17  ;;  %v551_v25 = vadd.f32 %v539_v23, %v524_v18 }
 0x1a6   : > { %v558_v26 = vmul.f32 %v550_v24, %v755_v4  ;;  %v559_v27 = vmul.f32 %v551_v25, %v759_v6 }
 0x1a8   : > { %566 = vst [vmem:[%s279_s24 + $0x20] sm:$0xff] %v558_v26 }
 0x1a9   : > { %567 = vst [vmem:[%s279_s24 + $0x28] sm:$0xff] %v559_v27 }
 0x1bd   : > { %v534_v29 = vpop.permute.xlu1 %533 }
 0x1be   : > { %v548_v30 = vadd.f32 %v534_v29, %v509_v17  ;;  %v549_v31 = vadd.f32 %v534_v29, %v524_v18 }
 0x1c0   : > { %v556_v32 = vmul.f32 %v548_v30, %v763_v8  ;;  %v557_v2 = vmul.f32 %v549_v31, %v765_v9 }
 0x1c2   : > { %564 = vst [vmem:[%s279_s24 + $0x10] sm:$0xff] %v556_v32 }
 0x1c3   : > { %565 = vst [vmem:[%s279_s24 + $0x18] sm:$0xff] %v557_v2 }
 0x1c5   : > { %v544_v3 = vpop.permute.xlu1 %543 }
 0x1c6   : > { %v552_v33 = vadd.f32 %v544_v3, %v509_v17  ;;  %v553_v34 = vadd.f32 %v544_v3, %v524_v18 }
 0x1c8   : > { %v560_v35 = vmul.f32 %v552_v33, %v767_v10  ;;  %v561_v4 = vmul.f32 %v553_v34, %v769_v11 }
 0x1ca   : > { %568 = vst [vmem:[%s279_s24 + $0x30] sm:$0xff] %v560_v35 }
 0x1cb   : > { %569 = vst [vmem:[%s279_s24 + $0x38] sm:$0xff] %v561_v4 }
 0x1cc PF: > { %s18_s26 = sadd.s32 1, %s686_s26  }
 0x1cd   : > { %p15_p4 = scmp.ge.s32.totalorder %s18_s26, 4  }
 0x1cf   :  { %17 = sbr.rel (!%p15_p4) target bundleno = 2 (0x2), region = 78 }

</bundles_post_ra>
